<compile_context>
chip_gen: v5e
topology: v5e:2x2
jax: 0.10.0
libtpu: 0.0.40
codegen_flags: <defaults>
</compile_context>

<pallas_src>
import functools

import jax
import jax.numpy as jnp
from jax import lax
from jax.experimental import pallas as pl
from jax.experimental.pallas import tpu as pltpu

ALPHA = 0.999                 # EMA momentum, as in MeanTeacher.__init__
_LANES = 128


def _round_up(x, m):
    return -(-x // m) * m


def _vmem_limit_bytes():
    """~3/4 of physical VMEM (96 MiB v5e/v6e, 48 MiB v7x); safe fallback 48 MiB."""
    cap = 64 * 1024 * 1024
    try:
        info = pltpu.get_tpu_info()
        cap = int(getattr(info, "vmem_capacity_bytes", cap))
    except Exception:
        pass
    return max(32 * 1024 * 1024, (cap * 3) // 4)


_VMEM_LIMIT = _vmem_limit_bytes()


# ----------------------------- Pallas kernels ----------------------------- #

def _gap_linear_kernel(x_ref, w_ref, b_ref, out_ref, feat_acc,
                       *, inv_hw, hw, thw, mask_hw):
    """GAP over spatial (tiled along the lane axis) + linear head.

    Grid: (N tiles [parallel], HW tiles [arbitrary / reduction]).
      x_ref:    (TN, C, THW)   native dtype (bf16/f32)
      w_ref:    (C, Kp)        native dtype, K padded to a multiple of 128
      b_ref:    (1, Kp)        native dtype
      out_ref:  (TN, Kp)       f32, resident across the reduction axis
      feat_acc: (TN, C)        f32 VMEM scratch (partial spatial sums)
    """
    h = pl.program_id(1)

    @pl.when(h == 0)
    def _():
        feat_acc[...] = jnp.zeros_like(feat_acc)

    x = x_ref[...]
    if mask_hw:  # static: only emitted when HW % THW != 0 (ragged last tile)
        lane = lax.broadcasted_iota(jnp.int32, x.shape, x.ndim - 1)
        x = jnp.where(h * thw + lane < hw, x, jnp.zeros_like(x))
    # Upcast fused into the reduction (no materialized f32 copy of the block).
    feat_acc[...] += jnp.sum(x, axis=-1, dtype=jnp.float32)

    @pl.when(h == pl.num_programs(1) - 1)
    def _():
        feat = feat_acc[...] * inv_hw                      # mean = sum / (H*W)
        logits = jnp.dot(feat, w_ref[...],
                         preferred_element_type=jnp.float32)
        out_ref[...] = (logits + b_ref[...]).astype(out_ref.dtype)


def _ema_kernel(p_ref, pm_ref, out_ref, *, alpha):
    # out = alpha * param_ema + (1 - alpha) * param   (elementwise, VPU, f32 math)
    p = p_ref[...].astype(jnp.float32)
    pm = pm_ref[...].astype(jnp.float32)
    out_ref[...] = (alpha * pm + (1.0 - alpha) * p).astype(out_ref.dtype)


# ------------------------------ tiling helpers ----------------------------- #

def _pick_n_tile(n, target=128):
    """Batch tile: prefer a multiple-of-8 divisor of N (no activation padding)."""
    target = max(8, (min(target, 128) // 8) * 8)
    if n <= target:
        half = n // 2
        if n >= 16 and half % 8 == 0:
            return half        # >=2 parallel batch tiles -> both v7x cores get work
        return n               # one full-batch tile (block == full dim, always legal)
    for t in range(target, 7, -8):
        if n % t == 0:
            return t
    return target              # ragged last tile; padded output rows sliced off


def _pick_hw_tile(hw, c, tn, itemsize, budget_bytes):
    """Spatial (lane) tile for the reduction axis: as big as the VMEM budget allows."""
    if hw <= _LANES:
        return hw                                   # full-extent block
    per_lane = max(1, tn * c * itemsize)
    if hw * per_lane <= budget_bytes:
        return hw                                   # whole spatial extent, 1 step
    t = max(_LANES, (budget_bytes // per_lane) // _LANES * _LANES)
    return min(t, (hw // _LANES) * _LANES)          # ragged tail masked in-kernel


def _ema_tiles(rows, cols, itemsize, budget):
    """~1-4 MiB elementwise blocks; dims are multiples of (8,128) or full extents."""
    if rows * cols * itemsize <= budget:
        return rows, cols
    if 8 * cols * itemsize <= budget:
        tc = cols
    else:
        tc = max(_LANES, min((cols // _LANES) * _LANES,
                             (budget // (8 * itemsize)) // _LANES * _LANES))
    tr = (budget // max(1, tc * itemsize)) // 8 * 8
    tr = max(8, min(tr, rows)) if rows >= 8 else rows
    return tr, tc


# ------------------------------ JAX wrappers ------------------------------ #

def gap_linear_forward(x_nchw, w_pad, b_pad):
    """Stand-in meta-arch forward (GAP + linear head), tiled & pipelined.

    w_pad: (C, Kp) with Kp a multiple of 128;  b_pad: (1, Kp).
    Returns (N, Kp) f32 logits (caller slices off the K padding).
    """
    N, C, H, W = x_nchw.shape
    HW = H * W
    Kp = w_pad.shape[1]
    x = x_nchw.reshape(N, C, HW)       # free reshape; keep the native dtype

    x_itemsize = jnp.dtype(x.dtype).itemsize
    w_bytes = int(w_pad.size) * jnp.dtype(w_pad.dtype).itemsize
    b_bytes = int(b_pad.size) * jnp.dtype(b_pad.dtype).itemsize

    # Batch tile: cap so 2x double-buffered minimal x blocks still fit VMEM.
    tn_cap = max(8, _VMEM_LIMIT // max(1, 4 * C * _LANES * x_itemsize))
    tn = _pick_n_tile(N, target=min(128, tn_cap))
    n_pad = _round_up(N, tn)

    # Per-block activation budget: subtract double-buffered weights/bias, the
    # resident output block and the f32 accumulator; ~40% of the rest per x buffer.
    fixed = 2 * (w_bytes + b_bytes) + 2 * tn * Kp * 4 + tn * C * 4
    avail = max(0, _VMEM_LIMIT - fixed)
    x_budget = max(tn * C * _LANES * x_itemsize, (avail * 2) // 5)
    thw = _pick_hw_tile(HW, C, tn, x_itemsize, x_budget)

    grid = (n_pad // tn, pl.cdiv(HW, thw))
    mask_hw = (HW % thw) != 0

    flops = int(2 * N * C * HW + 2 * N * C * Kp)
    bytes_accessed = int(x.size * x_itemsize + w_bytes + b_bytes + n_pad * Kp * 4)

    out = pl.pallas_call(
        functools.partial(_gap_linear_kernel, inv_hw=1.0 / float(HW),
                          hw=HW, thw=thw, mask_hw=mask_hw),
        out_shape=jax.ShapeDtypeStruct((n_pad, Kp), jnp.float32),
        grid=grid,
        in_specs=[
            pl.BlockSpec((tn, C, thw), lambda n, h: (n, 0, h)),
            pl.BlockSpec((C, Kp), lambda n, h: (0, 0)),
            pl.BlockSpec((1, Kp), lambda n, h: (0, 0)),
        ],
        out_specs=pl.BlockSpec((tn, Kp), lambda n, h: (n, 0)),
        scratch_shapes=[pltpu.VMEM((tn, C), jnp.float32)],
        compiler_params=pltpu.CompilerParams(
            dimension_semantics=("parallel", "arbitrary"),
            vmem_limit_bytes=_VMEM_LIMIT),
        cost_estimate=pl.CostEstimate(flops=flops, transcendentals=0,
                                      bytes_accessed=bytes_accessed),
    )(x, w_pad, b_pad)
    return out[:N] if n_pad != N else out


def _ema_leaf(p, pm, alpha):
    """param_ema <- alpha*param_ema + (1-alpha)*param, in-place on the real leaf."""
    shape, dtype = pm.shape, pm.dtype
    if pm.ndim == 0:
        p2, pm2 = p.reshape(1, 1), pm.reshape(1, 1)
    elif pm.ndim == 1:
        p2, pm2 = p.reshape(1, -1), pm.reshape(1, -1)
    else:
        cols = shape[-1]
        p2, pm2 = p.reshape(-1, cols), pm.reshape(-1, cols)

    rows, cols = pm2.shape
    itemsize = jnp.dtype(dtype).itemsize
    budget = min(4 << 20, _VMEM_LIMIT // 8)        # ~1-4 MiB blocks
    tr, tc = _ema_tiles(rows, cols, itemsize, budget)
    grid = (pl.cdiv(rows, tr), pl.cdiv(cols, tc))

    total = rows * cols
    out = pl.pallas_call(
        functools.partial(_ema_kernel, alpha=alpha),
        out_shape=jax.ShapeDtypeStruct((rows, cols), dtype),
        grid=grid,
        in_specs=[pl.BlockSpec((tr, tc), lambda i, j: (i, j)),
                  pl.BlockSpec((tr, tc), lambda i, j: (i, j))],
        out_specs=pl.BlockSpec((tr, tc), lambda i, j: (i, j)),
        input_output_aliases={1: 0},               # reuse the real params_ema buffer
        compiler_params=pltpu.CompilerParams(
            dimension_semantics=("parallel", "parallel"),
            vmem_limit_bytes=_VMEM_LIMIT),
        cost_estimate=pl.CostEstimate(flops=3 * total, transcendentals=0,
                                      bytes_accessed=3 * total * itemsize),
    )(p2, pm2)
    return out.reshape(shape)


def ema_update_params(params, params_ema, alpha=ALPHA):
    """Per-leaf EMA update, native dtype, no staging copies in HBM.

    Note: for bf16-stored params the per-step downcast can lose the (1-alpha)
    increment over many steps (same pitfall as the PyTorch original).
    """
    return jax.tree_util.tree_map(lambda p, pm: _ema_leaf(p, pm, alpha),
                                  params, params_ema)


class MeanTeacherPallas:
    """JAX/Pallas re-implementation of MeanTeacher forward semantics."""
    # TODO(synk): the real module instantiates cfg.MODEL.META_ARCHITECTURE from a
    # registry and returns its training loss_dict; that inner model is unavailable
    # here, so a GAP+linear stand-in is used and the training branch returns the
    # student outputs instead of a loss dict.

    def __init__(self, in_channels, num_classes, key):
        self.num_classes = num_classes
        w = (jax.random.normal(key, (in_channels, num_classes), jnp.float32)
             * (1.0 / jnp.sqrt(in_channels)))
        b = jnp.zeros((num_classes,), jnp.float32)
        self.params = {"w": w, "b": b}
        # model_ema = deepcopy(model); param_m.copy_(param)
        self.params_ema = jax.tree_util.tree_map(lambda v: v, self.params)
        self.alpha = ALPHA
        self.training = False

    def _padded_head(self, params):
        w = params["w"]                              # keep native dtype (no f32 upcast)
        b = params["b"]
        _, k = w.shape
        kp = _round_up(max(k, 1), _LANES)
        w_p = jnp.pad(w, ((0, 0), (0, kp - k)))
        b_p = jnp.pad(b, (0, kp - k)).reshape(1, kp)
        return w_p, b_p, kp

    def _update_mean_net(self):
        self.params_ema = ema_update_params(self.params, self.params_ema, self.alpha)

    def __call__(self, batched_inputs):
        if self.training:
            # Fused student + teacher forward: weights concatenated along the padded
            # class axis so the activation is streamed from HBM exactly once.
            w_s, b_s, kp = self._padded_head(self.params)
            w_t, b_t, _ = self._padded_head(self.params_ema)
            w_cat = jnp.concatenate([w_s, w_t], axis=1)
            b_cat = jnp.concatenate([b_s, b_t], axis=1)
            out = gap_linear_forward(batched_inputs, w_cat, b_cat)
            student = out[:, :self.num_classes]
            _teacher = out[:, kp:kp + self.num_classes]   # "no_grad" teacher pass (discarded, as in the original)
            self._update_mean_net()
            return student
        else:
            w_t, b_t, _ = self._padded_head(self.params_ema)
            out = gap_linear_forward(batched_inputs, w_t, b_t)
            return out[:, :self.num_classes]


if __name__ == "__main__":
    key = jax.random.PRNGKey(0)
    kx, kparam, kd = jax.random.split(key, 3)

    N, C, H, W = 2, 4, 16, 16
    num_classes = 8
    x = jax.random.normal(kx, (N, C, H, W), jnp.float32)   # NCHW like PyTorch

    mt = MeanTeacherPallas(in_channels=C, num_classes=num_classes, key=kparam)

    def ref_fwd(xin, w, b):
        feat = xin.reshape(N, C, -1).mean(axis=-1)
        return feat @ w + b

    # ---- Eval path: model_ema(batched_inputs) ----
    mt.training = False
    out_eval = mt(x)
    jax.block_until_ready(out_eval)
    assert out_eval.shape == (N, num_classes)
    assert jnp.allclose(out_eval,
                        ref_fwd(x, mt.params_ema["w"], mt.params_ema["b"]),
                        atol=1e-4, rtol=1e-4)

    # Move the student away from the teacher (as an optimizer step would) so the
    # EMA check below is not vacuous.
    mt.params = {
        "w": mt.params["w"] + 0.1 * jax.random.normal(kd, mt.params["w"].shape,
                                                      jnp.float32),
        "b": mt.params["b"] + 0.05,
    }
    old_ema = {k: v for k, v in mt.params_ema.items()}

    # ---- Train path: fused student+teacher forward, then EMA update ----
    mt.training = True
    out_train = mt(x)
    jax.block_until_ready(out_train)
    jax.block_until_ready(mt.params_ema["w"])
    assert out_train.shape == (N, num_classes)
    assert jnp.allclose(out_train, ref_fwd(x, mt.params["w"], mt.params["b"]),
                        atol=1e-4, rtol=1e-4)

    for name in mt.params:
        expected = ALPHA * old_ema[name] + (1.0 - ALPHA) * mt.params[name]
        assert jnp.allclose(mt.params_ema[name], expected, atol=1e-6), name

    print("KERNEL_OK")
</pallas_src>

<mosaic_0001>
module attributes {stable_mosaic.version = 11 : i64} {
  func.func @_gap_linear_kernel(%arg0: i32, %arg1: i32, %arg2: memref<2x4x256xf32, #tpu.memory_space<vmem>>, %arg3: memref<4x128xf32, #tpu.memory_space<vmem>>, %arg4: memref<1x128xf32, #tpu.memory_space<vmem>>, %arg5: memref<2x128xf32, #tpu.memory_space<vmem>>, %arg6: memref<2x4xf32, #tpu.memory_space<vmem>>) attributes {dimension_semantics = [#tpu.dimension_semantics<parallel>, #tpu.dimension_semantics<arbitrary>], iteration_bounds = array<i64: 1, 1>, scalar_prefetch = 0 : i64, scratch_operands = 1 : i64, tpu.core_type = #tpu.core_type<tc>, window_params = [{transform_indices = @transform_0, window_bounds = array<i64: 2, 4, 256>}, {pipeline_mode = #tpu.pipeline_mode<synchronous>, transform_indices = @transform_1, window_bounds = array<i64: 4, 128>}, {pipeline_mode = #tpu.pipeline_mode<synchronous>, transform_indices = @transform_2, window_bounds = array<i64: 1, 128>}, {transform_indices = @transform_3, window_bounds = array<i64: 2, 128>}]} {
    %c0_i32 = arith.constant 0 : i32
    %0 = arith.cmpi eq, %arg1, %c0_i32 : i32
    %1 = arith.extui %0 : i1 to i32
    %c0_i32_0 = arith.constant 0 : i32
    %2 = arith.cmpi ne, %1, %c0_i32_0 : i32
    scf.if %2 {
      %cst_9 = arith.constant 0.000000e+00 : f32
      %11 = vector.broadcast %cst_9 : f32 to vector<2x4xf32>
      %c0_10 = arith.constant 0 : index
      %c0_11 = arith.constant 0 : index
      %12 = vector.load %arg6[%c0_10, %c0_11] : memref<2x4xf32, #tpu.memory_space<vmem>>, vector<2x4xf32>
      tpu.vector_store %arg6[%c0_10, %c0_11], %11 {strides = array<i32>} : memref<2x4xf32, #tpu.memory_space<vmem>>, vector<2x4xf32>,
    } else {
    }
    %c0 = arith.constant 0 : index
    %c0_1 = arith.constant 0 : index
    %c0_2 = arith.constant 0 : index
    %3 = vector.load %arg2[%c0, %c0_1, %c0_2] : memref<2x4x256xf32, #tpu.memory_space<vmem>>, vector<2x4x256xf32>
    %c0_3 = arith.constant 0 : index
    %c0_4 = arith.constant 0 : index
    %4 = vector.load %arg6[%c0_3, %c0_4] : memref<2x4xf32, #tpu.memory_space<vmem>>, vector<2x4xf32>
    %cst = arith.constant dense<0.000000e+00> : vector<2x4xf32>
    %5 = vector.multi_reduction <add>, %3, %cst [2] : vector<2x4x256xf32> to vector<2x4xf32>
    %6 = arith.addf %4, %5 : vector<2x4xf32>
    %c0_5 = arith.constant 0 : index
    %c0_6 = arith.constant 0 : index
    %7 = vector.load %arg6[%c0_5, %c0_6] : memref<2x4xf32, #tpu.memory_space<vmem>>, vector<2x4xf32>
    tpu.vector_store %arg6[%c0_5, %c0_6], %6 {strides = array<i32>} : memref<2x4xf32, #tpu.memory_space<vmem>>, vector<2x4xf32>,
    %c0_i32_7 = arith.constant 0 : i32
    %8 = arith.cmpi eq, %arg1, %c0_i32_7 : i32
    %9 = arith.extui %8 : i1 to i32
    %c0_i32_8 = arith.constant 0 : i32
    %10 = arith.cmpi ne, %9, %c0_i32_8 : i32
    scf.if %10 {
      %c0_9 = arith.constant 0 : index
      %c0_10 = arith.constant 0 : index
      %11 = vector.load %arg6[%c0_9, %c0_10] : memref<2x4xf32, #tpu.memory_space<vmem>>, vector<2x4xf32>
      %cst_11 = arith.constant 3.906250e-03 : f32
      %12 = vector.broadcast %cst_11 : f32 to vector<2x4xf32>
      %13 = arith.mulf %11, %12 : vector<2x4xf32>
      %c0_12 = arith.constant 0 : index
      %c0_13 = arith.constant 0 : index
      %14 = vector.load %arg3[%c0_12, %c0_13] : memref<4x128xf32, #tpu.memory_space<vmem>>, vector<4x128xf32>
      %cst_14 = arith.constant dense<0.000000e+00> : vector<2x128xf32>
      %15 = tpu.matmul %13, %14, %cst_14 {dimension_numbers = #tpu.dot_dimension_numbers<[1], [0], [0], [1], [0, 0, 1, 1], [], []>} : vector<2x4xf32>, vector<4x128xf32>, vector<2x128xf32> -> vector<2x128xf32>
      %c0_15 = arith.constant 0 : index
      %c0_16 = arith.constant 0 : index
      %16 = vector.load %arg4[%c0_15, %c0_16] : memref<1x128xf32, #tpu.memory_space<vmem>>, vector<1x128xf32>
      %17 = vector.broadcast %16 : vector<1x128xf32> to vector<2x128xf32>
      %18 = arith.addf %15, %17 : vector<2x128xf32>
      %c0_17 = arith.constant 0 : index
      %c0_18 = arith.constant 0 : index
      %19 = vector.load %arg5[%c0_17, %c0_18] : memref<2x128xf32, #tpu.memory_space<vmem>>, vector<2x128xf32>
      tpu.vector_store %arg5[%c0_17, %c0_18], %18 {strides = array<i32>} : memref<2x128xf32, #tpu.memory_space<vmem>>, vector<2x128xf32>,
    } else {
    }
    return
  }
  func.func @transform_0(%arg0: i32, %arg1: i32) -> (i32, i32, i32) {
    %c0_i32 = arith.constant 0 : i32
    %c0_i32_0 = arith.constant 0 : i32
    return %arg0, %c0_i32, %arg1 : i32, i32, i32
  }
  func.func @transform_1(%arg0: i32, %arg1: i32) -> (i32, i32) {
    %c0_i32 = arith.constant 0 : i32
    %c0_i32_0 = arith.constant 0 : i32
    %c0_i32_1 = arith.constant 0 : i32
    return %c0_i32, %c0_i32_0 : i32, i32
  }
  func.func @transform_2(%arg0: i32, %arg1: i32) -> (i32, i32) {
    %c0_i32 = arith.constant 0 : i32
    %c0_i32_0 = arith.constant 0 : i32
    %c0_i32_1 = arith.constant 0 : i32
    return %c0_i32, %c0_i32_0 : i32, i32
  }
  func.func @transform_3(%arg0: i32, %arg1: i32) -> (i32, i32) {
    %c0_i32 = arith.constant 0 : i32
    %c0_i32_0 = arith.constant 0 : i32
    return %arg0, %c0_i32 : i32, i32
  }
}

</mosaic_0001>

<bundles_post_ra>
// kernel: tpu_custom_call.1
= control target key start
LH: loop header
LB: loop body
LE: loop exit
PB: predicated region body
PF: predicated region fallthrough
CT: control target
= control target key end

     0   :  { %8 = vsyncpa [#allocation4], 0  ;;  %s276_s0 = inlined_call_operand.hbm [shape: f32[2,4,256], index: 0, kind: input, shape index: {}]   ;;  %s277_s1 = inlined_call_operand.hbm [shape: f32[4,128], index: 1, kind: input, shape index: {}]   ;;  %s278_s2 = inlined_call_operand.vmem [shape: f32[1,128], index: 2, kind: input, shape index: {}]   ;;  %s279_s3 = inlined_call_operand.hbm [shape: f32[2,128], index: 3, kind: output, shape index: {}]  }
   0x1   :  { %9 = vsyncpa [#allocation7], 0 }
   0x2   :  { %10 = vsyncpa [#allocation5], 0  ;;  %s15_s14 = sshll.u32 %s276_s0, 4  ;;  %s233_s15 = smov [#allocation3]   ;;  %s16_s14 = int_to_ptr.hbm [resolvable:$true] %s15_s14 }
   0x3   :  { %s17_s16 = sshll.u32 %s233_s15, 4  ;;  %s29_s19 = sshll.u32 %s277_s1, 4  ;;  %s18_s16 = int_to_ptr.vmem [resolvable:$true] %s17_s16  ;;  %s30_s19 = int_to_ptr.hbm [resolvable:$true] %s29_s19 }
   0x4   :  { %s234_s20 = smov 128   ;;  %s235_s21 = smov 8  }
   0x5   :  { %23 = dma.hbm_to_vmem [thread:$0]  %s16_s14, 256, %s18_s16, [#allocation4], %s234_s20, %s234_s20, %s235_s21  }
   0x6   :  { %s236_s22 = smov [#allocation6]  }
   0x7   :  { %s31_s23 = sshll.u32 %s236_s22, 4  ;;  %s32_s23 = int_to_ptr.vmem [resolvable:$true] %s31_s23 }
   0x8   :  { %34 = dma.hbm_to_vmem [thread:$0]  %s30_s19, 64, %s32_s23, [#allocation7]  }
   0x9   :  { %227 = dma.done.wait [#allocation4], 256  }
   0xa   :  { %228 = vsyncadd [#allocation4], 4294967040 }
   0xb   :  { %229 = dma.done.wait [#allocation7], 64  }
   0xc   :  { %230 = vsyncadd [#allocation7], 4294967232  ;;  %v51_v0 = vld [vmem:[#allocation3] sm:$0xff]  ;;  %v52_v1 = vld [vmem:[#allocation3 + $0x8] sm:$0xff]  ;;  %vm67_vm0 = vcmask 1043456   ;;  %vm49_vm1 = vcmask 25600   ;;  %v80_v15 = vlaneseq }
   0xd   :  { %56 = vst [vmem:[#allocation1] ss:$2 sm:$0xff] %v51_v0  ;;  %v237_v12 = vmov 0.0   ;;  %v95_v13 = vld [vmem:[#allocation6] sm:$0xf]  ;;  %vm84_vm2 = vcmask 1041409  }
   0xe   :  { %60 = vst [vmem:[#allocation1 + $0x10] ss:$2 sm:$0xff] %v52_v1  ;;  %146 = vmatpush.msk.msra.mxu0 %vm67_vm0, %v95_v13  ;;  %v81_v16 = vand.u32 127, %v80_v15  ;;  %vm100_vm3 = vcmask 31744   ;;  %v154_v25 = vld [vmem:[%s278_s2] ss:$0 sm:$0xff] }
   0xf   :  { %50 = vst.msk [vmem:[#allocation2] sm:$0x3] %vm49_vm1, %v237_v12  ;;  %s238_s24 = smov [#allocation8]   ;;  %s135_s28 = sshll.u32 %s279_s3, 4  ;;  %s136_s28 = int_to_ptr.hbm [resolvable:$true] %s135_s28 }
  0x10   :  { %s133_s25 = sshll.u32 %s238_s24, 4  ;;  %s134_s25 = int_to_ptr.vmem [resolvable:$true] %s133_s25 }
  0x14   :  { %v57_v2 = vld.sshfl [vmem:[#allocation1] sm:$0xff pattern:$0x75316420]  ;;  %v58_v3 = vld.sshfl [vmem:[#allocation1 + $0x8] sm:$0xff pattern:$0x75316420] }
  0x15   :  { %v68_v4 = vsel %vm67_vm0, %v57_v2, 0.0  ;;  %v69_v5 = vsel %vm67_vm0, %v58_v3, 0.0  ;;  %v61_v7 = vld.sshfl [vmem:[#allocation1 + $0x10] sm:$0xff pattern:$0x75316420] }
  0x16   :  { %v70_v6 = vadd.f32 %v69_v5, %v68_v4  ;;  %v62_v8 = vld.sshfl [vmem:[#allocation1 + $0x18] sm:$0xff pattern:$0x75316420]  ;;  %v73_v9 = vsel %vm67_vm0, %v61_v7, 0.0  ;;  %v53_v19 = vld [vmem:[#allocation2] sm:$0x3] }
  0x17   :  { %v74_v10 = vsel %vm67_vm0, %v62_v8, 0.0 }
  0x18   :  { %71 = vadd.xlane.f32.xlu0 %v70_v6  ;;  %v75_v11 = vadd.f32 %v74_v10, %v73_v9 }
  0x20   :  { %76 = vadd.xlane.f32.xlu0 %v75_v11 }
  0x8b   :  { %v72_v14 = vpop.xlane.xlu0 %71 }
  0x8c   :  { %v82_v18 = vperm.slane %v72_v14, %v81_v16 }
  0x93   :  { %v77_v17 = vpop.xlane.xlu0 %76 }
  0x94   :  { %v83_v20 = vperm.slane %v77_v17, %v81_v16 }
  0x96   :  { %v85_v21 = vsel %vm84_vm2, %v83_v20, %v82_v18 }
  0x97   :  { %v87_v22 = vadd.f32 %v85_v21, %v53_v19 }
  0x99   :  { %89 = vst.msk [vmem:[#allocation2] sm:$0x3] %vm49_vm1, %v87_v22 }
  0xa0   :  { %v93_v23 = vld [vmem:[#allocation2] sm:$0x3] }
  0xa1   :  { %v94_v24 = vmul.f32 0.00390625, %v93_v23 }
  0xa3   :  { %147 = vmatmul.msk.f32.vlgmr.msra.gmra.mxu0 %vm100_vm3, %v94_v24 }
 0x120   :  { %v124_v26 = vpop.f32.mrf.mxu0 }
 0x121   :  { %v125_v27 = vadd.f32 %v154_v25, %v124_v26 }
 0x123   :  { %127 = vst [vmem:[#allocation8] sm:$0x3] %v125_v27 }
 0x124   :  { %138 = dma.vmem_to_hbm [thread:$0]  %s134_s25, 32, %s136_s28, [#allocation5]  }
 0x125   :  { %231 = dma.done.wait [#allocation5], 32  }
 0x126   :  { %232 = vsyncadd [#allocation5], 4294967264 }
 0x127   :  { %143 = vsyncpa [#allocation4], 1 }
 0x128   :  { %144 = vsyncpa [#allocation7], 1 }
 0x129   :  { %145 = vsyncpa [#allocation5], 1 }

</bundles_post_ra>
